<compile_context>
chip_gen: v7x
topology: tpu7x:2x2x1
jax: 0.10.0
libtpu: 0.0.40
codegen_flags: <defaults>
</compile_context>

<pallas_src>
import jax
import jax.numpy as jnp
from jax.experimental import pallas as pl
from jax.experimental.pallas import tpu as pltpu  # noqa: F401  (kept for TPU backend import side-effects / future tuning)


def _identity_kernel(x_hbm_ref, o_hbm_ref):
    # The output buffer aliases the input buffer (input_output_aliases={0: 0}),
    # so the result is already sitting in the output buffer.  Nothing to load,
    # compute, or store.
    del x_hbm_ref, o_hbm_ref


def pallas_identity(x):
    """Identity via an aliased, zero-copy Pallas call.  Any shape / dtype."""
    if x.size == 0:
        return x

    return pl.pallas_call(
        _identity_kernel,
        out_shape=jax.ShapeDtypeStruct(x.shape, x.dtype),
        # Keep both refs in HBM: no tiling, no (8,128) constraints, no VMEM.
        in_specs=[pl.BlockSpec(memory_space=pl.ANY)],
        out_specs=pl.BlockSpec(memory_space=pl.ANY),
        # Output 0 aliases input 0 -> the "copy" is a buffer donation.
        input_output_aliases={0: 0},
        # Pure pass-through: zero flops, zero bytes moved by the kernel itself.
        cost_estimate=pl.CostEstimate(flops=0, transcendentals=0, bytes_accessed=0),
    )(x)


if __name__ == "__main__":
    key = jax.random.PRNGKey(0)

    # Small NCHW input consistent with how NB201 ops are driven.
    N, C, H, W = 2, 4, 16, 16
    x = jax.random.normal(key, (N, C, H, W), jnp.float32)

    out = pallas_identity(x)
    out = jax.block_until_ready(out)

    assert out.shape == x.shape, out.shape
    assert out.dtype == x.dtype, out.dtype
    assert jnp.array_equal(out, x), "identity kernel did not reproduce its input"
    print("KERNEL_OK")
</pallas_src>

<mosaic_0001>
module attributes {stable_mosaic.version = 11 : i64} {
  func.func @_identity_kernel(%arg0: memref<2x4x16x16xf32, #tpu.memory_space<any>>, %arg1: memref<2x4x16x16xf32, #tpu.memory_space<any>>) attributes {dimension_semantics = [], scalar_prefetch = 0 : i64, scratch_operands = 0 : i64, tpu.core_type = #tpu.core_type<tc>} {
    return
  }
}

</mosaic_0001>

<bundles_post_ra>
// kernel: tpu_custom_call.1
= control target key start
LH: loop header
LB: loop body
LE: loop exit
PB: predicated region body
PF: predicated region fallthrough
CT: control target
= control target key end

     0   :  { %s16_s0 = inlined_call_operand.hbm [shape: f32[2,4,16,16], index: 0, kind: input, shape index: {}, may-alias: {0,1}]   ;;  %s17_s1 = inlined_call_operand.hbm [shape: f32[2,4,16,16], index: 1, kind: output, shape index: {}, may-alias: {0,1}]  }

</bundles_post_ra>
